<compile_context>
chip_gen: v5e
topology: v5e:2x2
jax: 0.10.0
libtpu: 0.0.40
codegen_flags: <defaults>
</compile_context>

<pallas_src>
import math
import numpy as np
import jax
import jax.numpy as jnp
from jax.experimental import pallas as pl
from jax.experimental.pallas import tpu as pltpu

LANE = 128


# ------------------------------------------------------------------ schedule
def linear_beta_schedule(timesteps):
    beta_start = 0.0001
    beta_end = 0.02
    return np.linspace(beta_start, beta_end, timesteps)


def make_diffusion_constants(num_timesteps):
    betas = linear_beta_schedule(num_timesteps)
    alphas = 1.0 - betas
    alphas_cumprod = np.cumprod(alphas, axis=0)
    return (
        jnp.asarray(np.sqrt(alphas_cumprod), dtype=jnp.float32),
        jnp.asarray(np.sqrt(1.0 - alphas_cumprod), dtype=jnp.float32),
    )


def timestep_embedding(t, dim):
    """Sinusoidal timestep embedding (glue, computed outside the kernel)."""
    half = dim // 2
    freqs = jnp.exp(
        -math.log(10000.0) * jnp.arange(half, dtype=jnp.float32) / float(half)
    )
    args = t.astype(jnp.float32)[:, None] * freqs[None, :]
    return jnp.concatenate([jnp.cos(args), jnp.sin(args)], axis=-1)  # (B, dim)


def _round_up(n, m):
    return ((n + m - 1) // m) * m


# ------------------------------------------------------------------ kernel
def _actdiff_kernel(coef_a_ref, coef_b_ref, mask_ref, x_ref, noise_ref,
                    tbias_ref, w1_ref, w2_ref, b2_ref, partial_ref):
    tm, dp = x_ref.shape

    x = x_ref[...]            # (tm, Dp) f32
    n = noise_ref[...]        # (tm, Dp) f32

    # q_sample: forward diffusion noising (f32 elementwise, VPU)
    x_noisy = coef_a_ref[...] * x + coef_b_ref[...] * n

    # denoiser MLP stand-in; MXU dots in bf16 with f32 accumulation
    h = jnp.dot(x_noisy.astype(jnp.bfloat16), w1_ref[...],
                preferred_element_type=jnp.float32)              # (tm, Hp)
    h = jnp.maximum(h + tbias_ref[...], 0.0)
    pred = jnp.dot(h.astype(jnp.bfloat16), w2_ref[...],
                   preferred_element_type=jnp.float32) + b2_ref[...]

    # l2 partial sums; mask kills any padded rows.
    diff = n - pred
    d2 = (diff * diff) * mask_ref[...]                           # (tm, Dp)
    # Fold to a fully (8, 128)-aligned tile (unmasked, lane-dense vst).
    partial_ref[...] = jnp.sum(d2.reshape(tm // 8, 8, dp), axis=0)


# ------------------------------------------------------------------ wrapper
def actdiff_loss_pallas(x, noise, coef_a, coef_b, temb, params):
    """Fused q_sample + denoiser + MSE loss. Returns scalar f32 loss."""
    B, T, D = x.shape
    H = params["w1"].shape[1]
    M = B * T

    Dp = _round_up(D, LANE)
    Hp = _round_up(H, LANE)
    # Row tile: multiple of 8, capped at 512; rows padded (and masked) to fit.
    tm = min(512, _round_up(M, 8))
    Mp = _round_up(M, tm)
    G = Mp // tm

    f32, bf16 = jnp.float32, jnp.bfloat16

    # Flatten batch/seq; zero-pad features to lane multiples and rows to Mp.
    x2 = jnp.pad(x.reshape(M, D).astype(f32), ((0, Mp - M), (0, Dp - D)))
    n2 = jnp.pad(noise.reshape(M, D).astype(f32), ((0, Mp - M), (0, Dp - D)))

    # Per-row q_sample coefficients + validity mask for padded rows.
    coef_a_row = jnp.broadcast_to(coef_a[:, None], (B, T)).reshape(M, 1).astype(f32)
    coef_b_row = jnp.broadcast_to(coef_b[:, None], (B, T)).reshape(M, 1).astype(f32)
    coef_a_row = jnp.pad(coef_a_row, ((0, Mp - M), (0, 0)))
    coef_b_row = jnp.pad(coef_b_row, ((0, Mp - M), (0, 0)))
    row_mask = jnp.pad(jnp.ones((M, 1), f32), ((0, Mp - M), (0, 0)))

    # Hoist the time-embedding projection out of the kernel (was an M=1 matmul).
    tbias = temb.astype(f32) @ params["wt"].astype(f32) + params["b1"].astype(f32)
    tbias = jnp.pad(tbias, ((0, 0), (0, Hp - H)))                 # (B, Hp)
    tbias_row = jnp.broadcast_to(tbias[:, None, :], (B, T, Hp)).reshape(M, Hp)
    tbias_row = jnp.pad(tbias_row, ((0, Mp - M), (0, 0)))

    # Weights: zero-pad and cast MXU operands to bf16.
    w1p = jnp.pad(params["w1"], ((0, Dp - D), (0, Hp - H))).astype(bf16)
    w2p = jnp.pad(params["w2"], ((0, Hp - H), (0, Dp - D))).astype(bf16)
    b2p = jnp.pad(params["b2"], ((0, 0), (0, Dp - D))).astype(f32)

    const = lambda i: (0, 0)
    row = lambda i: (i, 0)

    partials = pl.pallas_call(
        _actdiff_kernel,
        out_shape=jax.ShapeDtypeStruct((G * 8, Dp), f32),
        grid=(G,),
        in_specs=[
            pl.BlockSpec((tm, 1), row),       # coef_a
            pl.BlockSpec((tm, 1), row),       # coef_b
            pl.BlockSpec((tm, 1), row),       # row validity mask
            pl.BlockSpec((tm, Dp), row),      # x
            pl.BlockSpec((tm, Dp), row),      # noise
            pl.BlockSpec((tm, Hp), row),      # time bias (temb @ Wt + b1)
            pl.BlockSpec((Dp, Hp), const),    # w1 (bf16)
            pl.BlockSpec((Hp, Dp), const),    # w2 (bf16)
            pl.BlockSpec((1, Dp), const),     # b2
        ],
        out_specs=pl.BlockSpec((8, Dp), row),
        compiler_params=pltpu.CompilerParams(
            dimension_semantics=("parallel",)),
    )(coef_a_row, coef_b_row, row_mask, x2, n2, tbias_row, w1p, w2p, b2p)

    # Mean over the *true* element count; padding contributed exact zeros.
    return jnp.sum(partials) / float(B * T * D)


# ------------------------------------------------------------------ reference
def actdiff_loss_ref(x, noise, coef_a, coef_b, temb, params):
    ca = coef_a[:, None, None]
    cb = coef_b[:, None, None]
    x_noisy = ca * x + cb * noise
    tb = temb @ params["wt"] + params["b1"]                       # (B, H) f32
    h = jax.lax.dot_general(
        x_noisy.astype(jnp.bfloat16), params["w1"].astype(jnp.bfloat16),
        (((2,), (0,)), ((), ())), preferred_element_type=jnp.float32)
    h = jnp.maximum(h + tb[:, None, :], 0.0)
    pred = jax.lax.dot_general(
        h.astype(jnp.bfloat16), params["w2"].astype(jnp.bfloat16),
        (((2,), (0,)), ((), ())), preferred_element_type=jnp.float32)
    pred = pred + params["b2"]
    return jnp.mean((noise - pred) ** 2)


# ------------------------------------------------------------------ main
if __name__ == "__main__":
    B, T, D = 2, 8, 32      # batch, sequence length, feature dim
    H, Dt = 64, 32          # denoiser hidden dim, time-embedding dim
    NUM_TIMESTEPS = 1000

    key = jax.random.PRNGKey(0)
    kx, kn, kt, k1, k2, k3 = jax.random.split(key, 6)

    x = jax.random.normal(kx, (B, T, D), dtype=jnp.float32)
    noise = jax.random.normal(kn, (B, T, D), dtype=jnp.float32)
    t = jax.random.randint(kt, (B,), 0, NUM_TIMESTEPS)

    # deterministic synthetic denoiser parameters
    params = {
        "w1": jax.random.normal(k1, (D, H), dtype=jnp.float32) / math.sqrt(D),
        "wt": jax.random.normal(k2, (Dt, H), dtype=jnp.float32) / math.sqrt(Dt),
        "b1": jnp.zeros((1, H), dtype=jnp.float32),
        "w2": jax.random.normal(k3, (H, D), dtype=jnp.float32) / math.sqrt(H),
        "b2": jnp.zeros((1, D), dtype=jnp.float32),
    }

    sqrt_ac, sqrt_om_ac = make_diffusion_constants(NUM_TIMESTEPS)
    coef_a = sqrt_ac[t]                 # (B,)  _extract_into_tensor equivalent
    coef_b = sqrt_om_ac[t]              # (B,)
    temb = timestep_embedding(t, Dt)    # (B, Dt)

    loss = actdiff_loss_pallas(x, noise, coef_a, coef_b, temb, params)
    loss = jax.block_until_ready(loss)

    ref = actdiff_loss_ref(x, noise, coef_a, coef_b, temb, params)
    ref = jax.block_until_ready(ref)

    np.testing.assert_allclose(np.asarray(loss), np.asarray(ref),
                               rtol=1e-4, atol=1e-5)
    print("KERNEL_OK")
</pallas_src>

<mosaic_0001>
module attributes {stable_mosaic.version = 11 : i64} {
  func.func @_actdiff_kernel(%arg0: i32, %arg1: memref<16x1xf32, #tpu.memory_space<vmem>>, %arg2: memref<16x1xf32, #tpu.memory_space<vmem>>, %arg3: memref<16x1xf32, #tpu.memory_space<vmem>>, %arg4: memref<16x128xf32, #tpu.memory_space<vmem>>, %arg5: memref<16x128xf32, #tpu.memory_space<vmem>>, %arg6: memref<16x128xf32, #tpu.memory_space<vmem>>, %arg7: memref<128x128xbf16, #tpu.memory_space<vmem>>, %arg8: memref<128x128xbf16, #tpu.memory_space<vmem>>, %arg9: memref<1x128xf32, #tpu.memory_space<vmem>>, %arg10: memref<8x128xf32, #tpu.memory_space<vmem>>) attributes {dimension_semantics = [#tpu.dimension_semantics<parallel>], iteration_bounds = array<i64: 1>, scalar_prefetch = 0 : i64, scratch_operands = 0 : i64, tpu.core_type = #tpu.core_type<tc>, window_params = [{transform_indices = @transform_0, window_bounds = array<i64: 16, 1>}, {transform_indices = @transform_1, window_bounds = array<i64: 16, 1>}, {transform_indices = @transform_2, window_bounds = array<i64: 16, 1>}, {transform_indices = @transform_3, window_bounds = array<i64: 16, 128>}, {transform_indices = @transform_4, window_bounds = array<i64: 16, 128>}, {transform_indices = @transform_5, window_bounds = array<i64: 16, 128>}, {pipeline_mode = #tpu.pipeline_mode<synchronous>, transform_indices = @transform_6, window_bounds = array<i64: 128, 128>}, {pipeline_mode = #tpu.pipeline_mode<synchronous>, transform_indices = @transform_7, window_bounds = array<i64: 128, 128>}, {pipeline_mode = #tpu.pipeline_mode<synchronous>, transform_indices = @transform_8, window_bounds = array<i64: 1, 128>}, {transform_indices = @transform_9, window_bounds = array<i64: 8, 128>}]} {
    %c0 = arith.constant 0 : index
    %c0_0 = arith.constant 0 : index
    %0 = vector.load %arg4[%c0, %c0_0] : memref<16x128xf32, #tpu.memory_space<vmem>>, vector<16x128xf32>
    %c0_1 = arith.constant 0 : index
    %c0_2 = arith.constant 0 : index
    %1 = vector.load %arg5[%c0_1, %c0_2] : memref<16x128xf32, #tpu.memory_space<vmem>>, vector<16x128xf32>
    %c0_3 = arith.constant 0 : index
    %c0_4 = arith.constant 0 : index
    %2 = vector.load %arg1[%c0_3, %c0_4] : memref<16x1xf32, #tpu.memory_space<vmem>>, vector<16x1xf32>
    %3 = vector.broadcast %2 : vector<16x1xf32> to vector<16x128xf32>
    %4 = arith.mulf %3, %0 : vector<16x128xf32>
    %c0_5 = arith.constant 0 : index
    %c0_6 = arith.constant 0 : index
    %5 = vector.load %arg2[%c0_5, %c0_6] : memref<16x1xf32, #tpu.memory_space<vmem>>, vector<16x1xf32>
    %6 = vector.broadcast %5 : vector<16x1xf32> to vector<16x128xf32>
    %7 = arith.mulf %6, %1 : vector<16x128xf32>
    %8 = arith.addf %4, %7 : vector<16x128xf32>
    %9 = arith.truncf %8 : vector<16x128xf32> to vector<16x128xbf16>
    %c0_7 = arith.constant 0 : index
    %c0_8 = arith.constant 0 : index
    %10 = vector.load %arg7[%c0_7, %c0_8] : memref<128x128xbf16, #tpu.memory_space<vmem>>, vector<128x128xbf16>
    %cst = arith.constant dense<0.000000e+00> : vector<16x128xf32>
    %11 = tpu.matmul %9, %10, %cst {dimension_numbers = #tpu.dot_dimension_numbers<[1], [0], [0], [1], [0, 0, 1, 1], [], []>} : vector<16x128xbf16>, vector<128x128xbf16>, vector<16x128xf32> -> vector<16x128xf32>
    %c0_9 = arith.constant 0 : index
    %c0_10 = arith.constant 0 : index
    %12 = vector.load %arg6[%c0_9, %c0_10] : memref<16x128xf32, #tpu.memory_space<vmem>>, vector<16x128xf32>
    %13 = arith.addf %11, %12 : vector<16x128xf32>
    %cst_11 = arith.constant 0.000000e+00 : f32
    %14 = vector.broadcast %cst_11 : f32 to vector<16x128xf32>
    %15 = arith.maximumf %13, %14 : vector<16x128xf32>
    %16 = arith.truncf %15 : vector<16x128xf32> to vector<16x128xbf16>
    %c0_12 = arith.constant 0 : index
    %c0_13 = arith.constant 0 : index
    %17 = vector.load %arg8[%c0_12, %c0_13] : memref<128x128xbf16, #tpu.memory_space<vmem>>, vector<128x128xbf16>
    %cst_14 = arith.constant dense<0.000000e+00> : vector<16x128xf32>
    %18 = tpu.matmul %16, %17, %cst_14 {dimension_numbers = #tpu.dot_dimension_numbers<[1], [0], [0], [1], [0, 0, 1, 1], [], []>} : vector<16x128xbf16>, vector<128x128xbf16>, vector<16x128xf32> -> vector<16x128xf32>
    %c0_15 = arith.constant 0 : index
    %c0_16 = arith.constant 0 : index
    %19 = vector.load %arg9[%c0_15, %c0_16] : memref<1x128xf32, #tpu.memory_space<vmem>>, vector<1x128xf32>
    %20 = vector.broadcast %19 : vector<1x128xf32> to vector<16x128xf32>
    %21 = arith.addf %18, %20 : vector<16x128xf32>
    %22 = arith.subf %1, %21 : vector<16x128xf32>
    %23 = arith.mulf %22, %22 : vector<16x128xf32>
    %c0_17 = arith.constant 0 : index
    %c0_18 = arith.constant 0 : index
    %24 = vector.load %arg3[%c0_17, %c0_18] : memref<16x1xf32, #tpu.memory_space<vmem>>, vector<16x1xf32>
    %25 = vector.broadcast %24 : vector<16x1xf32> to vector<16x128xf32>
    %26 = arith.mulf %23, %25 : vector<16x128xf32>
    %27 = vector.shape_cast %26 : vector<16x128xf32> to vector<2x8x128xf32>
    %cst_19 = arith.constant dense<0.000000e+00> : vector<8x128xf32>
    %28 = vector.multi_reduction <add>, %27, %cst_19 [0] : vector<2x8x128xf32> to vector<8x128xf32>
    %c0_20 = arith.constant 0 : index
    %c0_21 = arith.constant 0 : index
    %29 = vector.load %arg10[%c0_20, %c0_21] : memref<8x128xf32, #tpu.memory_space<vmem>>, vector<8x128xf32>
    tpu.vector_store %arg10[%c0_20, %c0_21], %28 {strides = array<i32>} : memref<8x128xf32, #tpu.memory_space<vmem>>, vector<8x128xf32>,
    return
  }
  func.func @transform_0(%arg0: i32) -> (i32, i32) {
    %c0_i32 = arith.constant 0 : i32
    %c0_i32_0 = arith.constant 0 : i32
    return %arg0, %c0_i32 : i32, i32
  }
  func.func @transform_1(%arg0: i32) -> (i32, i32) {
    %c0_i32 = arith.constant 0 : i32
    %c0_i32_0 = arith.constant 0 : i32
    return %arg0, %c0_i32 : i32, i32
  }
  func.func @transform_2(%arg0: i32) -> (i32, i32) {
    %c0_i32 = arith.constant 0 : i32
    %c0_i32_0 = arith.constant 0 : i32
    return %arg0, %c0_i32 : i32, i32
  }
  func.func @transform_3(%arg0: i32) -> (i32, i32) {
    %c0_i32 = arith.constant 0 : i32
    %c0_i32_0 = arith.constant 0 : i32
    return %arg0, %c0_i32 : i32, i32
  }
  func.func @transform_4(%arg0: i32) -> (i32, i32) {
    %c0_i32 = arith.constant 0 : i32
    %c0_i32_0 = arith.constant 0 : i32
    return %arg0, %c0_i32 : i32, i32
  }
  func.func @transform_5(%arg0: i32) -> (i32, i32) {
    %c0_i32 = arith.constant 0 : i32
    %c0_i32_0 = arith.constant 0 : i32
    return %arg0, %c0_i32 : i32, i32
  }
  func.func @transform_6(%arg0: i32) -> (i32, i32) {
    %c0_i32 = arith.constant 0 : i32
    %c0_i32_0 = arith.constant 0 : i32
    %c0_i32_1 = arith.constant 0 : i32
    return %c0_i32, %c0_i32_0 : i32, i32
  }
  func.func @transform_7(%arg0: i32) -> (i32, i32) {
    %c0_i32 = arith.constant 0 : i32
    %c0_i32_0 = arith.constant 0 : i32
    %c0_i32_1 = arith.constant 0 : i32
    return %c0_i32, %c0_i32_0 : i32, i32
  }
  func.func @transform_8(%arg0: i32) -> (i32, i32) {
    %c0_i32 = arith.constant 0 : i32
    %c0_i32_0 = arith.constant 0 : i32
    %c0_i32_1 = arith.constant 0 : i32
    return %c0_i32, %c0_i32_0 : i32, i32
  }
  func.func @transform_9(%arg0: i32) -> (i32, i32) {
    %c0_i32 = arith.constant 0 : i32
    %c0_i32_0 = arith.constant 0 : i32
    return %arg0, %c0_i32 : i32, i32
  }
}

</mosaic_0001>

<bundles_post_ra>
// kernel: tpu_custom_call.1
= control target key start
LH: loop header
LB: loop body
LE: loop exit
PB: predicated region body
PF: predicated region fallthrough
CT: control target
= control target key end

     0   :  { %14 = vsyncpa [#allocation3], 0  ;;  %s575_s0 = inlined_call_operand.vmem [shape: f32[16,1], index: 0, kind: input, shape index: {}]   ;;  %s576_s1 = inlined_call_operand.vmem [shape: f32[16,1], index: 1, kind: input, shape index: {}]   ;;  %s577_s2 = inlined_call_operand.vmem [shape: f32[16,1], index: 2, kind: input, shape index: {}]   ;;  %s578_s3 = inlined_call_operand.vmem [shape: f32[16,128], index: 3, kind: input, shape index: {}]   ;;  %s579_s4 = inlined_call_operand.vmem [shape: f32[16,128], index: 4, kind: input, shape index: {}]   ;;  %s580_s5 = inlined_call_operand.vmem [shape: f32[16,128], index: 5, kind: input, shape index: {}]   ;;  %s581_s6 = inlined_call_operand.hbm [shape: bf16[128,128], index: 6, kind: input, shape index: {}]   ;;  %s582_s7 = inlined_call_operand.hbm [shape: bf16[128,128], index: 7, kind: input, shape index: {}]   ;;  %s583_s8 = inlined_call_operand.vmem [shape: f32[1,128], index: 8, kind: input, shape index: {}]   ;;  %s584_s9 = inlined_call_operand.hbm [shape: f32[8,128], index: 9, kind: output, shape index: {}]  }
   0x1   :  { %15 = vsyncpa [#allocation6], 0 }
   0x2   :  { %16 = vsyncpa [#allocation4], 0  ;;  %s33_s11 = sshll.u32 %s581_s6, 4  ;;  %s471_s12 = smov [#allocation2]   ;;  %s34_s11 = int_to_ptr.hbm [resolvable:$true] %s33_s11 }
   0x3   :  { %s35_s13 = sshll.u32 %s471_s12, 4  ;;  %s46_s16 = sshll.u32 %s582_s7, 4  ;;  %s36_s13 = int_to_ptr.vmem [resolvable:$true] %s35_s13  ;;  %s47_s16 = int_to_ptr.hbm [resolvable:$true] %s46_s16 }
   0x4   :  { %s472_s17 = smov 64   ;;  %s473_s18 = smov 4  }
   0x5   :  { %41 = dma.hbm_to_vmem [thread:$0]  %s34_s11, 1024, %s36_s13, [#allocation3], %s472_s17, %s472_s17, %s473_s18  }
   0x6   :  { %s474_s19 = smov [#allocation5]  }
   0x7   :  { %s48_s20 = sshll.u32 %s474_s19, 4  ;;  %s49_s20 = int_to_ptr.vmem [resolvable:$true] %s48_s20 }
   0x8   :  { %54 = dma.hbm_to_vmem [thread:$0]  %s47_s16, 1024, %s49_s20, [#allocation6], %s472_s17, %s472_s17, %s473_s18  }
   0x9   :  { %465 = dma.done.wait [#allocation3], 1024  }
   0xa   :  { %466 = vsyncadd [#allocation3], 4294966272 }
   0xb   :  { %467 = dma.done.wait [#allocation6], 1024  }
   0xc   :  { %468 = vsyncadd [#allocation6], 4294966272  ;;  %v475_v0 = vmov 0   ;;  %v83_v1 = vld [vmem:[%s576_s1] sm:$0xff]  ;;  %v374_v3 = vld [vmem:[#allocation2 + $0x38] sm:$0xff]  ;;  %s292_s21 = sshll.u32 %s584_s9, 4  ;;  %s293_s21 = int_to_ptr.hbm [resolvable:$true] %s292_s21 }
   0xd   :  { %390 = vset.pattern.permute.xlu1 %v475_v0  ;;  %389 = vset.pattern.permute.xlu0 %v475_v0  ;;  %v69_v2 = vld [vmem:[%s575_s0] sm:$0xff]  ;;  %v373_v4 = vld [vmem:[#allocation2 + $0x30] sm:$0xff]  ;;  %v84_v5 = vld [vmem:[%s576_s1 + $0x8] sm:$0xff] }
   0xe   :  { %391 = vset.pattern.permute.xlu2 %v475_v0  ;;  %87 = vperm.xlu1 %390, %v83_v1   ;;  %v70_v6 = vld [vmem:[%s575_s0 + $0x8] sm:$0xff]  ;;  %v371_v8 = vld [vmem:[#allocation2 + $0x20] sm:$0xff]  ;;  %v370_v9 = vld [vmem:[#allocation2 + $0x18] sm:$0xff] }
   0xf   :  { %73 = vperm.xlu0 %389, %v69_v2   ;;  %166 = vmatpush.bf16.msra.mxu0 %v374_v3  ;;  %v372_v7 = vld [vmem:[#allocation2 + $0x28] sm:$0xff]  ;;  %v369_v10 = vld [vmem:[#allocation2 + $0x10] sm:$0xff]  ;;  %v367_v12 = vld [vmem:[#allocation2] sm:$0xff] }
  0x10   :  { %v368_v11 = vld [vmem:[#allocation2 + $0x8] sm:$0xff]  ;;  %v382_v13 = vld [vmem:[#allocation5 + $0x38] sm:$0xff]  ;;  %v381_v14 = vld [vmem:[#allocation5 + $0x30] sm:$0xff] }
  0x11   :  { %251 = vmatpush.bf16.msra.mxu1 %v382_v13  ;;  %v380_v15 = vld [vmem:[#allocation5 + $0x28] sm:$0xff]  ;;  %v379_v16 = vld [vmem:[#allocation5 + $0x20] sm:$0xff]  ;;  %v378_v32 = vld [vmem:[#allocation5 + $0x18] sm:$0xff] }
  0x12   :  { %v67_v19 = vld [vmem:[%s579_s4] sm:$0xff]  ;;  %v68_v21 = vld [vmem:[%s579_s4 + $0x8] sm:$0xff]  ;;  %v377_v33 = vld [vmem:[#allocation5 + $0x10] sm:$0xff] }
  0x13   :  { %167 = vmatpush.bf16.msra.mxu0 %v373_v4  ;;  %v65_v20 = vld [vmem:[%s578_s3] sm:$0xff]  ;;  %v66_v22 = vld [vmem:[%s578_s3 + $0x8] sm:$0xff] }
  0x14   :  { %v376_v34 = vld [vmem:[#allocation5 + $0x8] sm:$0xff]  ;;  %v375_v35 = vld [vmem:[#allocation5] sm:$0xff] }
  0x15   :  { %252 = vmatpush.bf16.msra.mxu1 %v381_v14  ;;  %v269_v36 = vld [vmem:[%s577_s2] sm:$0xff]  ;;  %v270_v37 = vld [vmem:[%s577_s2 + $0x8] sm:$0xff]  ;;  %s476_s2 = smov [#allocation7]  }
  0x16   :  { %92 = vperm.xlu1 %390, %v84_v5   ;;  %273 = vperm.xlu2 %391, %v269_v36   ;;  %v116_v39 = vld [vmem:[%s580_s5] sm:$0xff]  ;;  %v117_v40 = vld [vmem:[%s580_s5 + $0x8] sm:$0xff]  ;;  %s290_s5 = sshll.u32 %s476_s2, 4  ;;  %s291_s5 = int_to_ptr.vmem [resolvable:$true] %s290_s5 }
  0x17   :  { %78 = vperm.xlu0 %389, %v70_v6   ;;  %168 = vmatpush.bf16.msra.mxu0 %v372_v7  ;;  %v392_v47 = vld [vmem:[%s583_s8] ss:$0 sm:$0xff] }
  0x19   :  { %253 = vmatpush.bf16.msra.mxu1 %v380_v15 }
  0x1b   :  { %169 = vmatpush.bf16.msra.mxu0 %v371_v8 }
  0x1d   :  { %254 = vmatpush.bf16.msra.mxu1 %v379_v16 }
  0x1e   :  { %278 = vperm.xlu2 %391, %v270_v37  }
  0x1f   :  { %170 = vmatpush.bf16.msra.mxu0 %v370_v9 }
  0x21   :  { %255 = vmatpush.bf16.msra.mxu1 %v378_v32 }
  0x23   :  { %171 = vmatpush.bf16.msra.mxu0 %v369_v10 }
  0x25   :  { %256 = vmatpush.bf16.msra.mxu1 %v377_v33 }
  0x27   :  { %172 = vmatpush.bf16.msra.mxu0 %v368_v11 }
  0x29   :  { %257 = vmatpush.bf16.msra.mxu1 %v376_v34 }
  0x2b   :  { %173 = vmatpush.bf16.msra.mxu0 %v367_v12 }
  0x2d   :  { %258 = vmatpush.bf16.msra.mxu1 %v375_v35 }
  0x70   :  { %v274_v50 = vpop.permute.xlu2 %273 }
  0x78   :  { %v279_v57 = vpop.permute.xlu2 %278 }
  0x80   :  { %v88_v17 = vpop.permute.xlu1 %87 }
  0x81   :  { %v74_v18 = vpop.permute.xlu0 %73  ;;  %v95_v23 = vmul.f32 %v88_v17, %v67_v19 }
  0x82   :  { %v81_v24 = vmul.f32 %v74_v18, %v65_v20 }
  0x84   :  { %v97_v29 = vadd.f32 %v95_v23, %v81_v24 }
  0x88   :  { %v93_v25 = vpop.permute.xlu1 %92 }
  0x89   :  { %v79_v26 = vpop.permute.xlu0 %78  ;;  %v96_v27 = vmul.f32 %v93_v25, %v68_v21 }
  0x8a   :  { %v82_v28 = vmul.f32 %v79_v26, %v66_v22 }
  0x8c   :  { %v98_v30 = vadd.f32 %v96_v27, %v82_v28 }
  0x8e   :  { %v99_v31 = vpack.c.bf16 %v98_v30, %v97_v29 }
  0x90   :  { %174 = vmatmul.bf16.vlgmr.msra.gmra.mxu0 %v99_v31 }
 0x10d   :  { %v175_v38 = vpop.f32.mrf.mxu0 }
 0x10e   :  { %v176_v41 = vadd.f32 %v175_v38, %v116_v39 }
 0x110   :  { %v180_v44 = vmax.f32 %v176_v41, 0.0 }
 0x115   :  { %v177_v42 = vpop.f32.mrf.mxu0 }
 0x116   :  { %v178_v43 = vadd.f32 %v177_v42, %v117_v40 }
 0x118   :  { %v181_v45 = vmax.f32 %v178_v43, 0.0 }
 0x11a   :  { %v182_v46 = vpack.c.bf16 %v181_v45, %v180_v44 }
 0x11c   :  { %259 = vmatmul.bf16.vlgmr.msra.gmra.mxu1 %v182_v46 }
 0x199   :  { %v260_v48 = vpop.f32.mrf.mxu1 }
 0x19a   :  { %v261_v49 = vadd.f32 %v392_v47, %v260_v48 }
 0x19c   :  { %v265_v51 = vsub.f32 %v67_v19, %v261_v49 }
 0x19e   :  { %v267_v54 = vmul.f32 %v265_v51, %v265_v51 }
 0x1a0   :  { %v281_v58 = vmul.f32 %v274_v50, %v267_v54 }
 0x1a1   :  { %v262_v52 = vpop.f32.mrf.mxu1 }
 0x1a2   :  { %v263_v53 = vadd.f32 %v392_v47, %v262_v52 }
 0x1a4   :  { %v266_v55 = vsub.f32 %v68_v21, %v263_v53 }
 0x1a6   :  { %v268_v56 = vmul.f32 %v266_v55, %v266_v55 }
 0x1a8   :  { %v282_v59 = vmul.f32 %v279_v57, %v268_v56 }
 0x1aa   :  { %v283_v60 = vadd.f32 %v282_v59, %v281_v58 }
 0x1ac   :  { %284 = vst [vmem:[#allocation7] sm:$0xff] %v283_v60 }
 0x1ad   :  { %295 = dma.vmem_to_hbm [thread:$0]  %s291_s5, 128, %s293_s21, [#allocation4]  }
 0x1ae   :  { %469 = dma.done.wait [#allocation4], 128  }
 0x1af   :  { %470 = vsyncadd [#allocation4], 4294967168 }
 0x1b0   :  { %300 = vsyncpa [#allocation3], 1 }
 0x1b1   :  { %301 = vsyncpa [#allocation6], 1 }
 0x1b2   :  { %302 = vsyncpa [#allocation4], 1 }

</bundles_post_ra>
